<compile_context>
chip_gen: v6e
topology: v6e:2x2x1
jax: 0.10.0
libtpu: 0.0.40
codegen_flags: <defaults>
</compile_context>

<pallas_src>
import numpy as np
import jax
import jax.numpy as jnp
from jax.experimental import pallas as pl
from jax.experimental.pallas import tpu as pltpu

BN_EPS = 1e-5  # PyTorch nn.BatchNorm1d default

# (in_channels, out_channels) of the six Conv1d(k=3)+BN+Sigmoid layers, in order.
_STAGE_IO = [(32, 16), (16, 16), (16, 8), (8, 8), (8, 4), (4, 4)]


def _rup8(n):
    return max(8, ((n + 7) // 8) * 8)


# ---------------------------------------------------------------------------
# kernel
# ---------------------------------------------------------------------------
def _conv3_bn_sigmoid(h, wf, shift):
    """Conv1d(k=3, pad=1) + folded eval-mode BatchNorm + Sigmoid on a (Cin, L) slab.

    wf is (Cout, 3*Cin): the three taps stacked along the contraction dim so the whole
    conv is ONE MXU matmul. shift is (Cout, 1) (= BN beta + (bias - mean) * scale).
    """
    cin = h.shape[0]
    zero = jnp.zeros((cin, 1), jnp.float32)
    x_m1 = jnp.concatenate([zero, h[:, :-1]], axis=1)   # tap k=0 -> x[m-1] (zero pad)
    x_p1 = jnp.concatenate([h[:, 1:], zero], axis=1)    # tap k=2 -> x[m+1] (zero pad)
    xs = jnp.concatenate([x_m1, h, x_p1], axis=0)       # (3*Cin, L)
    y = jnp.dot(wf, xs, preferred_element_type=jnp.float32) + shift
    return jax.nn.sigmoid(y)


def decoder_kernel(x_ref,
                   u1_ref, w0_ref, s0_ref, w1_ref, s1_ref,
                   u2_ref, w2_ref, s2_ref, w3_ref, s3_ref,
                   u3_ref, w4_ref, s4_ref, w5_ref, s5_ref,
                   wo_ref, bo_ref, o_ref):
    h = x_ref[0].astype(jnp.float32)                    # (32, L0)

    # ---- up1: linear 2x upsample (MXU matmul) + 2x (conv3 -> BN -> Sigmoid) ----
    h = jnp.dot(h, u1_ref[...], preferred_element_type=jnp.float32)
    h = _conv3_bn_sigmoid(h, w0_ref[...], s0_ref[...])
    h = _conv3_bn_sigmoid(h, w1_ref[...], s1_ref[...])

    # ---- up2 ----
    h = jnp.dot(h, u2_ref[...], preferred_element_type=jnp.float32)
    h = _conv3_bn_sigmoid(h, w2_ref[...], s2_ref[...])
    h = _conv3_bn_sigmoid(h, w3_ref[...], s3_ref[...])

    # ---- up3 ----
    h = jnp.dot(h, u3_ref[...], preferred_element_type=jnp.float32)
    h = _conv3_bn_sigmoid(h, w4_ref[...], s4_ref[...])
    h = _conv3_bn_sigmoid(h, w5_ref[...], s5_ref[...])

    # ---- outc: Conv1d(kernel_size=1) == per-position linear, no BN / activation ----
    out = jnp.dot(wo_ref[...], h, preferred_element_type=jnp.float32) + bo_ref[...]
    o_ref[0] = out.astype(o_ref.dtype)


# ---------------------------------------------------------------------------
# host-side parameter preparation
# ---------------------------------------------------------------------------
def _upsample_matrix(L):
    """(L, 2L) matrix of nn.Upsample(scale_factor=2, mode='linear', align_corners=False)."""
    U = np.zeros((L, 2 * L), np.float32)
    for j in range(L):
        U[max(j - 1, 0), 2 * j] += 0.25        # out[2j]   = .25*in[j-1] + .75*in[j]
        U[j, 2 * j] += 0.75
        U[j, 2 * j + 1] += 0.75                # out[2j+1] = .75*in[j]   + .25*in[j+1]
        U[min(j + 1, L - 1), 2 * j + 1] += 0.25
    return jnp.asarray(U)


def _fold_conv_bn(w, b, gamma, beta, mean, var, pcin, pcout):
    """Fold eval-mode BN (+ conv bias) into the conv weight; pad channels to x8.

    Returns wf (pcout, 3*pcin) with taps stacked along the contraction dim (row index
    t*pcin + ci) and shift (pcout, 1).
    """
    cout, cin, k = w.shape
    scale = gamma * jax.lax.rsqrt(var + BN_EPS)                 # (cout,)
    wf = jnp.transpose(w * scale[:, None, None], (0, 2, 1))     # (cout, 3, cin)
    wf = jnp.pad(wf, ((0, pcout - cout), (0, 0), (0, pcin - cin)))
    wf = wf.reshape(pcout, k * pcin)
    shift = jnp.pad(beta + (b - mean) * scale, (0, pcout - cout))[:, None]
    return wf, shift


def decoder_conv_bvae(x, params, n_classes):
    B, C, L0 = x.shape
    assert C == 32, "decoder_conv_bVAE expects 32 input channels"

    folded = []
    for i, (cin, cout) in enumerate(_STAGE_IO):
        folded.append(_fold_conv_bn(
            params[f"w{i}"], params[f"b{i}"], params[f"g{i}"], params[f"beta{i}"],
            params[f"mean{i}"], params[f"var{i}"], _rup8(cin), _rup8(cout)))

    u1 = _upsample_matrix(L0)
    u2 = _upsample_matrix(2 * L0)
    u3 = _upsample_matrix(4 * L0)

    # OutConv (k=1): (n_classes, 4, 1) -> (n_classes, 8) with zero-padded input columns.
    wo = jnp.pad(params["wo"][:, :, 0], ((0, 0), (0, _rup8(4) - 4)))
    bo = params["bo"][:, None]

    operands = [
        x,
        u1, folded[0][0], folded[0][1], folded[1][0], folded[1][1],
        u2, folded[2][0], folded[2][1], folded[3][0], folded[3][1],
        u3, folded[4][0], folded[4][1], folded[5][0], folded[5][1],
        wo, bo,
    ]

    def full(a):
        return pl.BlockSpec(a.shape, lambda b, _nd=a.ndim: (0,) * _nd)

    in_specs = [pl.BlockSpec((1, C, L0), lambda b: (b, 0, 0))]
    in_specs += [full(a) for a in operands[1:]]

    out_len = 8 * L0
    return pl.pallas_call(
        decoder_kernel,
        out_shape=jax.ShapeDtypeStruct((B, n_classes, out_len), x.dtype),
        grid_spec=pltpu.PrefetchScalarGridSpec(
            num_scalar_prefetch=0,
            grid=(B,),
            in_specs=in_specs,
            out_specs=pl.BlockSpec((1, n_classes, out_len), lambda b: (b, 0, 0)),
        ),
        compiler_params=pltpu.CompilerParams(dimension_semantics=("parallel",)),
    )(*operands)


# ---------------------------------------------------------------------------
# pure-JAX reference (eval-mode PyTorch semantics) + demo
# ---------------------------------------------------------------------------
def _upsample2x_ref(x):
    left = jnp.concatenate([x[..., :1], x[..., :-1]], axis=-1)
    right = jnp.concatenate([x[..., 1:], x[..., -1:]], axis=-1)
    even = 0.25 * left + 0.75 * x
    odd = 0.75 * x + 0.25 * right
    B, C, L = x.shape
    return jnp.stack([even, odd], axis=-1).reshape(B, C, 2 * L)


def _conv1d_ref(x, w, b, pad):
    out = jax.lax.conv_general_dilated(
        x, w, window_strides=(1,), padding=[(pad, pad)],
        dimension_numbers=("NCH", "OIH", "NCH"))
    return out + b[None, :, None]


def _bn_ref(x, gamma, beta, mean, var):
    inv = gamma / jnp.sqrt(var + BN_EPS)
    return (x - mean[None, :, None]) * inv[None, :, None] + beta[None, :, None]


def reference(x, p, n_classes):
    h = x
    for stage in range(3):
        h = _upsample2x_ref(h)
        for j in range(2):
            i = 2 * stage + j
            h = _conv1d_ref(h, p[f"w{i}"], p[f"b{i}"], 1)
            h = _bn_ref(h, p[f"g{i}"], p[f"beta{i}"], p[f"mean{i}"], p[f"var{i}"])
            h = jax.nn.sigmoid(h)
    return _conv1d_ref(h, p["wo"], p["bo"], 0)


def init_params(key, n_classes):
    p = {}
    keys = iter(jax.random.split(key, 6 * len(_STAGE_IO) + 2))
    for i, (cin, cout) in enumerate(_STAGE_IO):
        p[f"w{i}"] = 0.3 * jax.random.normal(next(keys), (cout, cin, 3), jnp.float32)
        p[f"b{i}"] = 0.1 * jax.random.normal(next(keys), (cout,), jnp.float32)
        p[f"g{i}"] = 1.0 + 0.1 * jax.random.normal(next(keys), (cout,), jnp.float32)
        p[f"beta{i}"] = 0.1 * jax.random.normal(next(keys), (cout,), jnp.float32)
        p[f"mean{i}"] = 0.1 * jax.random.normal(next(keys), (cout,), jnp.float32)
        p[f"var{i}"] = 0.5 + jax.random.uniform(next(keys), (cout,), jnp.float32)
        # TODO(synk): training-mode BatchNorm (batch statistics) is not modeled;
        # the kernel implements eval/inference-mode BN folded into the conv weights.
    p["wo"] = 0.3 * jax.random.normal(next(keys), (n_classes, 4, 1), jnp.float32)
    p["bo"] = 0.1 * jax.random.normal(next(keys), (n_classes,), jnp.float32)
    return p


if __name__ == "__main__":
    B, C_IN, L0 = 2, 32, 16       # latent input: (batch, 32 channels, length 16)
    N_CLASSES = 3

    key = jax.random.PRNGKey(0)
    kx, kp = jax.random.split(key)
    x = jax.random.normal(kx, (B, C_IN, L0), jnp.float32)
    params = init_params(kp, N_CLASSES)

    out = decoder_conv_bvae(x, params, N_CLASSES)
    out = jax.block_until_ready(out)

    ref = reference(x, params, N_CLASSES)
    assert out.shape == (B, N_CLASSES, 8 * L0)
    assert jnp.allclose(out, ref, rtol=1e-3, atol=1e-3), float(jnp.abs(out - ref).max())

    print("KERNEL_OK")
</pallas_src>

<mosaic_0001>
module attributes {stable_mosaic.version = 11 : i64} {
  func.func @decoder_kernel(%arg0: i32, %arg1: memref<1x32x16xf32, #tpu.memory_space<vmem>>, %arg2: memref<16x32xf32, #tpu.memory_space<vmem>>, %arg3: memref<16x96xf32, #tpu.memory_space<vmem>>, %arg4: memref<16x1xf32, #tpu.memory_space<vmem>>, %arg5: memref<16x48xf32, #tpu.memory_space<vmem>>, %arg6: memref<16x1xf32, #tpu.memory_space<vmem>>, %arg7: memref<32x64xf32, #tpu.memory_space<vmem>>, %arg8: memref<8x48xf32, #tpu.memory_space<vmem>>, %arg9: memref<8x1xf32, #tpu.memory_space<vmem>>, %arg10: memref<8x24xf32, #tpu.memory_space<vmem>>, %arg11: memref<8x1xf32, #tpu.memory_space<vmem>>, %arg12: memref<64x128xf32, #tpu.memory_space<vmem>>, %arg13: memref<8x24xf32, #tpu.memory_space<vmem>>, %arg14: memref<8x1xf32, #tpu.memory_space<vmem>>, %arg15: memref<8x24xf32, #tpu.memory_space<vmem>>, %arg16: memref<8x1xf32, #tpu.memory_space<vmem>>, %arg17: memref<3x8xf32, #tpu.memory_space<vmem>>, %arg18: memref<3x1xf32, #tpu.memory_space<vmem>>, %arg19: memref<1x3x128xf32, #tpu.memory_space<vmem>>) attributes {dimension_semantics = [#tpu.dimension_semantics<parallel>], iteration_bounds = array<i64: 2>, scalar_prefetch = 0 : i64, scratch_operands = 0 : i64, tpu.core_type = #tpu.core_type<tc>, window_params = [{transform_indices = @transform_0, window_bounds = array<i64: 1, 32, 16>}, {pipeline_mode = #tpu.pipeline_mode<synchronous>, transform_indices = @transform_1, window_bounds = array<i64: 16, 32>}, {pipeline_mode = #tpu.pipeline_mode<synchronous>, transform_indices = @transform_2, window_bounds = array<i64: 16, 96>}, {pipeline_mode = #tpu.pipeline_mode<synchronous>, transform_indices = @transform_3, window_bounds = array<i64: 16, 1>}, {pipeline_mode = #tpu.pipeline_mode<synchronous>, transform_indices = @transform_4, window_bounds = array<i64: 16, 48>}, {pipeline_mode = #tpu.pipeline_mode<synchronous>, transform_indices = @transform_5, window_bounds = array<i64: 16, 1>}, {pipeline_mode = #tpu.pipeline_mode<synchronous>, transform_indices = @transform_6, window_bounds = array<i64: 32, 64>}, {pipeline_mode = #tpu.pipeline_mode<synchronous>, transform_indices = @transform_7, window_bounds = array<i64: 8, 48>}, {pipeline_mode = #tpu.pipeline_mode<synchronous>, transform_indices = @transform_8, window_bounds = array<i64: 8, 1>}, {pipeline_mode = #tpu.pipeline_mode<synchronous>, transform_indices = @transform_9, window_bounds = array<i64: 8, 24>}, {pipeline_mode = #tpu.pipeline_mode<synchronous>, transform_indices = @transform_10, window_bounds = array<i64: 8, 1>}, {pipeline_mode = #tpu.pipeline_mode<synchronous>, transform_indices = @transform_11, window_bounds = array<i64: 64, 128>}, {pipeline_mode = #tpu.pipeline_mode<synchronous>, transform_indices = @transform_12, window_bounds = array<i64: 8, 24>}, {pipeline_mode = #tpu.pipeline_mode<synchronous>, transform_indices = @transform_13, window_bounds = array<i64: 8, 1>}, {pipeline_mode = #tpu.pipeline_mode<synchronous>, transform_indices = @transform_14, window_bounds = array<i64: 8, 24>}, {pipeline_mode = #tpu.pipeline_mode<synchronous>, transform_indices = @transform_15, window_bounds = array<i64: 8, 1>}, {pipeline_mode = #tpu.pipeline_mode<synchronous>, transform_indices = @transform_16, window_bounds = array<i64: 3, 8>}, {pipeline_mode = #tpu.pipeline_mode<synchronous>, transform_indices = @transform_17, window_bounds = array<i64: 3, 1>}, {transform_indices = @transform_18, window_bounds = array<i64: 1, 3, 128>}]} {
    %c0 = arith.constant 0 : index
    %c0_0 = arith.constant 0 : index
    %c0_1 = arith.constant 0 : index
    %0 = vector.load %arg1[%c0, %c0_0, %c0_1] : memref<1x32x16xf32, #tpu.memory_space<vmem>>, vector<1x32x16xf32>
    %1 = vector.shape_cast %0 : vector<1x32x16xf32> to vector<32x16xf32>
    %c0_2 = arith.constant 0 : index
    %c0_3 = arith.constant 0 : index
    %2 = vector.load %arg2[%c0_2, %c0_3] : memref<16x32xf32, #tpu.memory_space<vmem>>, vector<16x32xf32>
    %cst = arith.constant dense<0.000000e+00> : vector<32x32xf32>
    %3 = tpu.matmul %1, %2, %cst {dimension_numbers = #tpu.dot_dimension_numbers<[1], [0], [0], [1], [0, 0, 1, 1], [], []>} : vector<32x16xf32>, vector<16x32xf32>, vector<32x32xf32> -> vector<32x32xf32>
    %c0_4 = arith.constant 0 : index
    %c0_5 = arith.constant 0 : index
    %4 = vector.load %arg3[%c0_4, %c0_5] : memref<16x96xf32, #tpu.memory_space<vmem>>, vector<16x96xf32>
    %c0_6 = arith.constant 0 : index
    %c0_7 = arith.constant 0 : index
    %5 = vector.load %arg4[%c0_6, %c0_7] : memref<16x1xf32, #tpu.memory_space<vmem>>, vector<16x1xf32>
    %cst_8 = arith.constant 0.000000e+00 : f32
    %6 = vector.broadcast %cst_8 : f32 to vector<32x1xf32>
    %7 = vector.extract_strided_slice %3 {offsets = [0, 0], sizes = [32, 31], strides = [1, 1]} : vector<32x32xf32> to vector<32x31xf32>
    %8 = tpu.concatenate %6, %7 in 1 : vector<32x1xf32>, vector<32x31xf32> -> vector<32x32xf32>
    %9 = vector.extract_strided_slice %3 {offsets = [0, 1], sizes = [32, 31], strides = [1, 1]} : vector<32x32xf32> to vector<32x31xf32>
    %10 = tpu.concatenate %9, %6 in 1 : vector<32x31xf32>, vector<32x1xf32> -> vector<32x32xf32>
    %11 = tpu.concatenate %8, %3, %10 in 0 : vector<32x32xf32>, vector<32x32xf32>, vector<32x32xf32> -> vector<96x32xf32>
    %cst_9 = arith.constant dense<0.000000e+00> : vector<16x32xf32>
    %12 = tpu.matmul %4, %11, %cst_9 {dimension_numbers = #tpu.dot_dimension_numbers<[1], [0], [0], [1], [0, 0, 1, 1], [], []>} : vector<16x96xf32>, vector<96x32xf32>, vector<16x32xf32> -> vector<16x32xf32>
    %13 = vector.broadcast %5 : vector<16x1xf32> to vector<16x32xf32>
    %14 = arith.addf %12, %13 : vector<16x32xf32>
    %15 = arith.negf %14 : vector<16x32xf32>
    %16 = math.exp %15 : vector<16x32xf32>
    %cst_10 = arith.constant 1.000000e+00 : f32
    %17 = vector.broadcast %cst_10 : f32 to vector<16x32xf32>
    %18 = arith.addf %17, %16 : vector<16x32xf32>
    %19 = arith.divf %17, %18 : vector<16x32xf32>
    %c0_11 = arith.constant 0 : index
    %c0_12 = arith.constant 0 : index
    %20 = vector.load %arg5[%c0_11, %c0_12] : memref<16x48xf32, #tpu.memory_space<vmem>>, vector<16x48xf32>
    %c0_13 = arith.constant 0 : index
    %c0_14 = arith.constant 0 : index
    %21 = vector.load %arg6[%c0_13, %c0_14] : memref<16x1xf32, #tpu.memory_space<vmem>>, vector<16x1xf32>
    %cst_15 = arith.constant 0.000000e+00 : f32
    %22 = vector.broadcast %cst_15 : f32 to vector<16x1xf32>
    %23 = vector.extract_strided_slice %19 {offsets = [0, 0], sizes = [16, 31], strides = [1, 1]} : vector<16x32xf32> to vector<16x31xf32>
    %24 = tpu.concatenate %22, %23 in 1 : vector<16x1xf32>, vector<16x31xf32> -> vector<16x32xf32>
    %25 = vector.extract_strided_slice %19 {offsets = [0, 1], sizes = [16, 31], strides = [1, 1]} : vector<16x32xf32> to vector<16x31xf32>
    %26 = tpu.concatenate %25, %22 in 1 : vector<16x31xf32>, vector<16x1xf32> -> vector<16x32xf32>
    %27 = tpu.concatenate %24, %19, %26 in 0 : vector<16x32xf32>, vector<16x32xf32>, vector<16x32xf32> -> vector<48x32xf32>
    %cst_16 = arith.constant dense<0.000000e+00> : vector<16x32xf32>
    %28 = tpu.matmul %20, %27, %cst_16 {dimension_numbers = #tpu.dot_dimension_numbers<[1], [0], [0], [1], [0, 0, 1, 1], [], []>} : vector<16x48xf32>, vector<48x32xf32>, vector<16x32xf32> -> vector<16x32xf32>
    %29 = vector.broadcast %21 : vector<16x1xf32> to vector<16x32xf32>
    %30 = arith.addf %28, %29 : vector<16x32xf32>
    %31 = arith.negf %30 : vector<16x32xf32>
    %32 = math.exp %31 : vector<16x32xf32>
    %cst_17 = arith.constant 1.000000e+00 : f32
    %33 = vector.broadcast %cst_17 : f32 to vector<16x32xf32>
    %34 = arith.addf %33, %32 : vector<16x32xf32>
    %35 = arith.divf %33, %34 : vector<16x32xf32>
    %c0_18 = arith.constant 0 : index
    %c0_19 = arith.constant 0 : index
    %36 = vector.load %arg7[%c0_18, %c0_19] : memref<32x64xf32, #tpu.memory_space<vmem>>, vector<32x64xf32>
    %cst_20 = arith.constant dense<0.000000e+00> : vector<16x64xf32>
    %37 = tpu.matmul %35, %36, %cst_20 {dimension_numbers = #tpu.dot_dimension_numbers<[1], [0], [0], [1], [0, 0, 1, 1], [], []>} : vector<16x32xf32>, vector<32x64xf32>, vector<16x64xf32> -> vector<16x64xf32>
    %c0_21 = arith.constant 0 : index
    %c0_22 = arith.constant 0 : index
    %38 = vector.load %arg8[%c0_21, %c0_22] : memref<8x48xf32, #tpu.memory_space<vmem>>, vector<8x48xf32>
    %c0_23 = arith.constant 0 : index
    %c0_24 = arith.constant 0 : index
    %39 = vector.load %arg9[%c0_23, %c0_24] : memref<8x1xf32, #tpu.memory_space<vmem>>, vector<8x1xf32>
    %cst_25 = arith.constant 0.000000e+00 : f32
    %40 = vector.broadcast %cst_25 : f32 to vector<16x1xf32>
    %41 = vector.extract_strided_slice %37 {offsets = [0, 0], sizes = [16, 63], strides = [1, 1]} : vector<16x64xf32> to vector<16x63xf32>
    %42 = tpu.concatenate %40, %41 in 1 : vector<16x1xf32>, vector<16x63xf32> -> vector<16x64xf32>
    %43 = vector.extract_strided_slice %37 {offsets = [0, 1], sizes = [16, 63], strides = [1, 1]} : vector<16x64xf32> to vector<16x63xf32>
    %44 = tpu.concatenate %43, %40 in 1 : vector<16x63xf32>, vector<16x1xf32> -> vector<16x64xf32>
    %45 = tpu.concatenate %42, %37, %44 in 0 : vector<16x64xf32>, vector<16x64xf32>, vector<16x64xf32> -> vector<48x64xf32>
    %cst_26 = arith.constant dense<0.000000e+00> : vector<8x64xf32>
    %46 = tpu.matmul %38, %45, %cst_26 {dimension_numbers = #tpu.dot_dimension_numbers<[1], [0], [0], [1], [0, 0, 1, 1], [], []>} : vector<8x48xf32>, vector<48x64xf32>, vector<8x64xf32> -> vector<8x64xf32>
    %47 = vector.broadcast %39 : vector<8x1xf32> to vector<8x64xf32>
    %48 = arith.addf %46, %47 : vector<8x64xf32>
    %49 = arith.negf %48 : vector<8x64xf32>
    %50 = math.exp %49 : vector<8x64xf32>
    %cst_27 = arith.constant 1.000000e+00 : f32
    %51 = vector.broadcast %cst_27 : f32 to vector<8x64xf32>
    %52 = arith.addf %51, %50 : vector<8x64xf32>
    %53 = arith.divf %51, %52 : vector<8x64xf32>
    %c0_28 = arith.constant 0 : index
    %c0_29 = arith.constant 0 : index
    %54 = vector.load %arg10[%c0_28, %c0_29] : memref<8x24xf32, #tpu.memory_space<vmem>>, vector<8x24xf32>
    %c0_30 = arith.constant 0 : index
    %c0_31 = arith.constant 0 : index
    %55 = vector.load %arg11[%c0_30, %c0_31] : memref<8x1xf32, #tpu.memory_space<vmem>>, vector<8x1xf32>
    %cst_32 = arith.constant 0.000000e+00 : f32
    %56 = vector.broadcast %cst_32 : f32 to vector<8x1xf32>
    %57 = vector.extract_strided_slice %53 {offsets = [0, 0], sizes = [8, 63], strides = [1, 1]} : vector<8x64xf32> to vector<8x63xf32>
    %58 = tpu.concatenate %56, %57 in 1 : vector<8x1xf32>, vector<8x63xf32> -> vector<8x64xf32>
    %59 = vector.extract_strided_slice %53 {offsets = [0, 1], sizes = [8, 63], strides = [1, 1]} : vector<8x64xf32> to vector<8x63xf32>
    %60 = tpu.concatenate %59, %56 in 1 : vector<8x63xf32>, vector<8x1xf32> -> vector<8x64xf32>
    %61 = tpu.concatenate %58, %53, %60 in 0 : vector<8x64xf32>, vector<8x64xf32>, vector<8x64xf32> -> vector<24x64xf32>
    %cst_33 = arith.constant dense<0.000000e+00> : vector<8x64xf32>
    %62 = tpu.matmul %54, %61, %cst_33 {dimension_numbers = #tpu.dot_dimension_numbers<[1], [0], [0], [1], [0, 0, 1, 1], [], []>} : vector<8x24xf32>, vector<24x64xf32>, vector<8x64xf32> -> vector<8x64xf32>
    %63 = vector.broadcast %55 : vector<8x1xf32> to vector<8x64xf32>
    %64 = arith.addf %62, %63 : vector<8x64xf32>
    %65 = arith.negf %64 : vector<8x64xf32>
    %66 = math.exp %65 : vector<8x64xf32>
    %cst_34 = arith.constant 1.000000e+00 : f32
    %67 = vector.broadcast %cst_34 : f32 to vector<8x64xf32>
    %68 = arith.addf %67, %66 : vector<8x64xf32>
    %69 = arith.divf %67, %68 : vector<8x64xf32>
    %c0_35 = arith.constant 0 : index
    %c0_36 = arith.constant 0 : index
    %70 = vector.load %arg12[%c0_35, %c0_36] : memref<64x128xf32, #tpu.memory_space<vmem>>, vector<64x128xf32>
    %cst_37 = arith.constant dense<0.000000e+00> : vector<8x128xf32>
    %71 = tpu.matmul %69, %70, %cst_37 {dimension_numbers = #tpu.dot_dimension_numbers<[1], [0], [0], [1], [0, 0, 1, 1], [], []>} : vector<8x64xf32>, vector<64x128xf32>, vector<8x128xf32> -> vector<8x128xf32>
    %c0_38 = arith.constant 0 : index
    %c0_39 = arith.constant 0 : index
    %72 = vector.load %arg13[%c0_38, %c0_39] : memref<8x24xf32, #tpu.memory_space<vmem>>, vector<8x24xf32>
    %c0_40 = arith.constant 0 : index
    %c0_41 = arith.constant 0 : index
    %73 = vector.load %arg14[%c0_40, %c0_41] : memref<8x1xf32, #tpu.memory_space<vmem>>, vector<8x1xf32>
    %cst_42 = arith.constant 0.000000e+00 : f32
    %74 = vector.broadcast %cst_42 : f32 to vector<8x1xf32>
    %75 = vector.extract_strided_slice %71 {offsets = [0, 0], sizes = [8, 127], strides = [1, 1]} : vector<8x128xf32> to vector<8x127xf32>
    %76 = tpu.concatenate %74, %75 in 1 : vector<8x1xf32>, vector<8x127xf32> -> vector<8x128xf32>
    %77 = vector.extract_strided_slice %71 {offsets = [0, 1], sizes = [8, 127], strides = [1, 1]} : vector<8x128xf32> to vector<8x127xf32>
    %78 = tpu.concatenate %77, %74 in 1 : vector<8x127xf32>, vector<8x1xf32> -> vector<8x128xf32>
    %79 = tpu.concatenate %76, %71, %78 in 0 : vector<8x128xf32>, vector<8x128xf32>, vector<8x128xf32> -> vector<24x128xf32>
    %cst_43 = arith.constant dense<0.000000e+00> : vector<8x128xf32>
    %80 = tpu.matmul %72, %79, %cst_43 {dimension_numbers = #tpu.dot_dimension_numbers<[1], [0], [0], [1], [0, 0, 1, 1], [], []>} : vector<8x24xf32>, vector<24x128xf32>, vector<8x128xf32> -> vector<8x128xf32>
    %81 = vector.broadcast %73 : vector<8x1xf32> to vector<8x128xf32>
    %82 = arith.addf %80, %81 : vector<8x128xf32>
    %83 = arith.negf %82 : vector<8x128xf32>
    %84 = math.exp %83 : vector<8x128xf32>
    %cst_44 = arith.constant 1.000000e+00 : f32
    %85 = vector.broadcast %cst_44 : f32 to vector<8x128xf32>
    %86 = arith.addf %85, %84 : vector<8x128xf32>
    %87 = arith.divf %85, %86 : vector<8x128xf32>
    %c0_45 = arith.constant 0 : index
    %c0_46 = arith.constant 0 : index
    %88 = vector.load %arg15[%c0_45, %c0_46] : memref<8x24xf32, #tpu.memory_space<vmem>>, vector<8x24xf32>
    %c0_47 = arith.constant 0 : index
    %c0_48 = arith.constant 0 : index
    %89 = vector.load %arg16[%c0_47, %c0_48] : memref<8x1xf32, #tpu.memory_space<vmem>>, vector<8x1xf32>
    %cst_49 = arith.constant 0.000000e+00 : f32
    %90 = vector.broadcast %cst_49 : f32 to vector<8x1xf32>
    %91 = vector.extract_strided_slice %87 {offsets = [0, 0], sizes = [8, 127], strides = [1, 1]} : vector<8x128xf32> to vector<8x127xf32>
    %92 = tpu.concatenate %90, %91 in 1 : vector<8x1xf32>, vector<8x127xf32> -> vector<8x128xf32>
    %93 = vector.extract_strided_slice %87 {offsets = [0, 1], sizes = [8, 127], strides = [1, 1]} : vector<8x128xf32> to vector<8x127xf32>
    %94 = tpu.concatenate %93, %90 in 1 : vector<8x127xf32>, vector<8x1xf32> -> vector<8x128xf32>
    %95 = tpu.concatenate %92, %87, %94 in 0 : vector<8x128xf32>, vector<8x128xf32>, vector<8x128xf32> -> vector<24x128xf32>
    %cst_50 = arith.constant dense<0.000000e+00> : vector<8x128xf32>
    %96 = tpu.matmul %88, %95, %cst_50 {dimension_numbers = #tpu.dot_dimension_numbers<[1], [0], [0], [1], [0, 0, 1, 1], [], []>} : vector<8x24xf32>, vector<24x128xf32>, vector<8x128xf32> -> vector<8x128xf32>
    %97 = vector.broadcast %89 : vector<8x1xf32> to vector<8x128xf32>
    %98 = arith.addf %96, %97 : vector<8x128xf32>
    %99 = arith.negf %98 : vector<8x128xf32>
    %100 = math.exp %99 : vector<8x128xf32>
    %cst_51 = arith.constant 1.000000e+00 : f32
    %101 = vector.broadcast %cst_51 : f32 to vector<8x128xf32>
    %102 = arith.addf %101, %100 : vector<8x128xf32>
    %103 = arith.divf %101, %102 : vector<8x128xf32>
    %c0_52 = arith.constant 0 : index
    %c0_53 = arith.constant 0 : index
    %104 = vector.load %arg17[%c0_52, %c0_53] : memref<3x8xf32, #tpu.memory_space<vmem>>, vector<3x8xf32>
    %cst_54 = arith.constant dense<0.000000e+00> : vector<3x128xf32>
    %105 = tpu.matmul %104, %103, %cst_54 {dimension_numbers = #tpu.dot_dimension_numbers<[1], [0], [0], [1], [0, 0, 1, 1], [], []>} : vector<3x8xf32>, vector<8x128xf32>, vector<3x128xf32> -> vector<3x128xf32>
    %c0_55 = arith.constant 0 : index
    %c0_56 = arith.constant 0 : index
    %106 = vector.load %arg18[%c0_55, %c0_56] : memref<3x1xf32, #tpu.memory_space<vmem>>, vector<3x1xf32>
    %107 = vector.broadcast %106 : vector<3x1xf32> to vector<3x128xf32>
    %108 = arith.addf %105, %107 : vector<3x128xf32>
    %c0_57 = arith.constant 0 : index
    %c0_58 = arith.constant 0 : index
    %c0_59 = arith.constant 0 : index
    %109 = vector.load %arg19[%c0_57, %c0_58, %c0_59] : memref<1x3x128xf32, #tpu.memory_space<vmem>>, vector<1x3x128xf32>
    %110 = vector.shape_cast %109 : vector<1x3x128xf32> to vector<3x128xf32>
    %111 = vector.shape_cast %108 : vector<3x128xf32> to vector<1x3x128xf32>
    tpu.vector_store %arg19[%c0_57, %c0_58, %c0_59], %111 {strides = array<i32>} : memref<1x3x128xf32, #tpu.memory_space<vmem>>, vector<1x3x128xf32>,
    return
  }
  func.func @transform_0(%arg0: i32) -> (i32, i32, i32) {
    %c0_i32 = arith.constant 0 : i32
    %c0_i32_0 = arith.constant 0 : i32
    %c0_i32_1 = arith.constant 0 : i32
    return %arg0, %c0_i32, %c0_i32_0 : i32, i32, i32
  }
  func.func @transform_1(%arg0: i32) -> (i32, i32) {
    %c0_i32 = arith.constant 0 : i32
    %c0_i32_0 = arith.constant 0 : i32
    %c0_i32_1 = arith.constant 0 : i32
    return %c0_i32, %c0_i32_0 : i32, i32
  }
  func.func @transform_2(%arg0: i32) -> (i32, i32) {
    %c0_i32 = arith.constant 0 : i32
    %c0_i32_0 = arith.constant 0 : i32
    %c0_i32_1 = arith.constant 0 : i32
    return %c0_i32, %c0_i32_0 : i32, i32
  }
  func.func @transform_3(%arg0: i32) -> (i32, i32) {
    %c0_i32 = arith.constant 0 : i32
    %c0_i32_0 = arith.constant 0 : i32
    %c0_i32_1 = arith.constant 0 : i32
    return %c0_i32, %c0_i32_0 : i32, i32
  }
  func.func @transform_4(%arg0: i32) -> (i32, i32) {
    %c0_i32 = arith.constant 0 : i32
    %c0_i32_0 = arith.constant 0 : i32
    %c0_i32_1 = arith.constant 0 : i32
    return %c0_i32, %c0_i32_0 : i32, i32
  }
  func.func @transform_5(%arg0: i32) -> (i32, i32) {
    %c0_i32 = arith.constant 0 : i32
    %c0_i32_0 = arith.constant 0 : i32
    %c0_i32_1 = arith.constant 0 : i32
    return %c0_i32, %c0_i32_0 : i32, i32
  }
  func.func @transform_6(%arg0: i32) -> (i32, i32) {
    %c0_i32 = arith.constant 0 : i32
    %c0_i32_0 = arith.constant 0 : i32
    %c0_i32_1 = arith.constant 0 : i32
    return %c0_i32, %c0_i32_0 : i32, i32
  }
  func.func @transform_7(%arg0: i32) -> (i32, i32) {
    %c0_i32 = arith.constant 0 : i32
    %c0_i32_0 = arith.constant 0 : i32
    %c0_i32_1 = arith.constant 0 : i32
    return %c0_i32, %c0_i32_0 : i32, i32
  }
  func.func @transform_8(%arg0: i32) -> (i32, i32) {
    %c0_i32 = arith.constant 0 : i32
    %c0_i32_0 = arith.constant 0 : i32
    %c0_i32_1 = arith.constant 0 : i32
    return %c0_i32, %c0_i32_0 : i32, i32
  }
  func.func @transform_9(%arg0: i32) -> (i32, i32) {
    %c0_i32 = arith.constant 0 : i32
    %c0_i32_0 = arith.constant 0 : i32
    %c0_i32_1 = arith.constant 0 : i32
    return %c0_i32, %c0_i32_0 : i32, i32
  }
  func.func @transform_10(%arg0: i32) -> (i32, i32) {
    %c0_i32 = arith.constant 0 : i32
    %c0_i32_0 = arith.constant 0 : i32
    %c0_i32_1 = arith.constant 0 : i32
    return %c0_i32, %c0_i32_0 : i32, i32
  }
  func.func @transform_11(%arg0: i32) -> (i32, i32) {
    %c0_i32 = arith.constant 0 : i32
    %c0_i32_0 = arith.constant 0 : i32
    %c0_i32_1 = arith.constant 0 : i32
    return %c0_i32, %c0_i32_0 : i32, i32
  }
  func.func @transform_12(%arg0: i32) -> (i32, i32) {
    %c0_i32 = arith.constant 0 : i32
    %c0_i32_0 = arith.constant 0 : i32
    %c0_i32_1 = arith.constant 0 : i32
    return %c0_i32, %c0_i32_0 : i32, i32
  }
  func.func @transform_13(%arg0: i32) -> (i32, i32) {
    %c0_i32 = arith.constant 0 : i32
    %c0_i32_0 = arith.constant 0 : i32
    %c0_i32_1 = arith.constant 0 : i32
    return %c0_i32, %c0_i32_0 : i32, i32
  }
  func.func @transform_14(%arg0: i32) -> (i32, i32) {
    %c0_i32 = arith.constant 0 : i32
    %c0_i32_0 = arith.constant 0 : i32
    %c0_i32_1 = arith.constant 0 : i32
    return %c0_i32, %c0_i32_0 : i32, i32
  }
  func.func @transform_15(%arg0: i32) -> (i32, i32) {
    %c0_i32 = arith.constant 0 : i32
    %c0_i32_0 = arith.constant 0 : i32
    %c0_i32_1 = arith.constant 0 : i32
    return %c0_i32, %c0_i32_0 : i32, i32
  }
  func.func @transform_16(%arg0: i32) -> (i32, i32) {
    %c0_i32 = arith.constant 0 : i32
    %c0_i32_0 = arith.constant 0 : i32
    %c0_i32_1 = arith.constant 0 : i32
    return %c0_i32, %c0_i32_0 : i32, i32
  }
  func.func @transform_17(%arg0: i32) -> (i32, i32) {
    %c0_i32 = arith.constant 0 : i32
    %c0_i32_0 = arith.constant 0 : i32
    %c0_i32_1 = arith.constant 0 : i32
    return %c0_i32, %c0_i32_0 : i32, i32
  }
  func.func @transform_18(%arg0: i32) -> (i32, i32, i32) {
    %c0_i32 = arith.constant 0 : i32
    %c0_i32_0 = arith.constant 0 : i32
    %c0_i32_1 = arith.constant 0 : i32
    return %arg0, %c0_i32, %c0_i32_0 : i32, i32, i32
  }
}

</mosaic_0001>

<bundles_post_ra>
// kernel: tpu_custom_call.1
= control target key start
LH: loop header
LB: loop body
LE: loop exit
PB: predicated region body
PF: predicated region fallthrough
CT: control target
= control target key end

     0   :  { %s2473_s0 = inlined_call_operand.vmem [shape: f32[2,32,16], index: 0, kind: input, shape index: {}]   ;;  %s2474_s1 = inlined_call_operand.vmem [shape: f32[16,32], index: 1, kind: input, shape index: {}]   ;;  %s2475_s2 = inlined_call_operand.vmem [shape: f32[16,96], index: 2, kind: input, shape index: {}]   ;;  %s2476_s3 = inlined_call_operand.vmem [shape: f32[16,1], index: 3, kind: input, shape index: {}]   ;;  %s2477_s4 = inlined_call_operand.vmem [shape: f32[16,48], index: 4, kind: input, shape index: {}]   ;;  %s2478_s5 = inlined_call_operand.vmem [shape: f32[16,1], index: 5, kind: input, shape index: {}]   ;;  %s2479_s6 = inlined_call_operand.vmem [shape: f32[32,64], index: 6, kind: input, shape index: {}]   ;;  %s2480_s7 = inlined_call_operand.hbm [shape: f32[8,48], index: 7, kind: input, shape index: {}]   ;;  %s2481_s8 = inlined_call_operand.vmem [shape: f32[8,1], index: 8, kind: input, shape index: {}]   ;;  %s2482_s9 = inlined_call_operand.vmem [shape: f32[8,24], index: 9, kind: input, shape index: {}]   ;;  %s2483_s10 = inlined_call_operand.vmem [shape: f32[8,1], index: 10, kind: input, shape index: {}]   ;;  %s2484_s11 = inlined_call_operand.vmem [shape: f32[64,128], index: 11, kind: input, shape index: {}]   ;;  %s2485_s12 = inlined_call_operand.vmem [shape: f32[8,24], index: 12, kind: input, shape index: {}]   ;;  %s2486_s13 = inlined_call_operand.vmem [shape: f32[8,1], index: 13, kind: input, shape index: {}]   ;;  %s2487_s14 = inlined_call_operand.hbm [shape: f32[8,24], index: 14, kind: input, shape index: {}]   ;;  %s2488_s15 = inlined_call_operand.vmem [shape: f32[8,1], index: 15, kind: input, shape index: {}]   ;;  %s2489_s16 = inlined_call_operand.vmem [shape: f32[3,8], index: 16, kind: input, shape index: {}]   ;;  %s2490_s17 = inlined_call_operand.vmem [shape: f32[3,1], index: 17, kind: input, shape index: {}]   ;;  %s2491_s18 = inlined_call_operand.vmem [shape: f32[2,3,128], index: 18, kind: output, shape index: {}]  }
   0x1   :  { %2496 = sst [smem:[#allocation8_spill]] %s2473_s0 }
   0x2   :  { %2497 = sst [smem:[#allocation9_spill]] %s2474_s1 }
   0x3   :  { %2498 = sst [smem:[#allocation10_spill]] %s2475_s2 }
   0x4   :  { %23 = vsyncpa [#allocation3], 0 }
   0x5   :  { %24 = vsyncpa [#allocation5], 0  ;;  %s2196_s27 = smov 0  }
   0x6 LB: > { %s2202_s28 = sadd.s32 4294967295, %s2092_s27   ;;  %p1695_p0 = scmp.ge.s32.totalorder %s2092_s27, 1  ;;  %s2092_s27 = sphi %s2196_s27, %s30_s27  }
   0x7   : > { %p444_p1 = scmp.lt.s32.totalorder %s2092_s27, 3  ;;  %p2494_p2 = scmp.eq.s32.totalorder %s2202_s28, 0 }
   0x8   : > { %s2094_s30 = smov [#allocation2]   ;;  %s2095_s19 = smov [#allocation4]  }
   0x9   : > { %p2207_p3 = pnand %p1695_p0, %p444_p1  ;;  %s475_s0 = sshll.u32 %s2094_s30, 4  ;;  %s476_s0 = int_to_ptr.vmem [resolvable:$true] %s475_s0 }
   0xa   : > { %s504_s1 = sshll.u32 %s2095_s19, 4  ;;  %s2037_s21 = scalar_lea.vmem %s476_s0, 128  ;;  %s505_s1 = int_to_ptr.vmem [resolvable:$true] %s504_s1 }
   0xb   : > { %s2499_s29 = scalar_select %p2207_p3, 1, 0 }
   0xc   : > { %p1966_p4 = pneg %p2207_p3  ;;  %p2038_p7 = scmp.ne.s32.totalorder %s476_s0, %s2037_s21 }
   0xd   : > { %p2045_p10 = scmp.lt.s32.totalorder %s476_s0, %s476_s0  ;;  %p2046_p11 = scmp.lt.s32.totalorder %s2037_s21, %s2037_s21 }
   0xe   : > { %p2215_p5 = pnand %p2494_p2, %p1966_p4 }
   0xf   : > { %p2047_p12 = por %p2046_p11, %p2045_p10 }
  0x10   : > { %p2028_p6 = pneg %p2215_p5 }
  0x12   : > { %p2040_p8 = pnand %p2038_p7, %p2028_p6 }
  0x14   : > { %p2041_p9 = pneg %p2040_p8 }
  0x16   : > { %p2048_p13 = pnand %p2047_p12, %p2041_p9 }
  0x18   : > { %2051 = shalt.err (!%p2048_p13)
}
  0x19   : > { %1969 = dma.hbm_to_vmem [thread:$0]  (!%p2215_p5), %s2480_s7, 128, %s476_s0, [#allocation3]  }
  0x1a   : > { %s2063_s23 = scalar_lea.vmem %s505_s1, 128  ;;  %p2071_p7 = scmp.lt.s32.totalorder %s505_s1, %s505_s1 }
  0x1b   : > { %p2064_p0 = scmp.ne.s32.totalorder %s505_s1, %s2063_s23  ;;  %p2072_p8 = scmp.lt.s32.totalorder %s2063_s23, %s2063_s23 }
  0x1d   : > { %p2066_p1 = pnand %p2064_p0, %p2028_p6  ;;  %p2073_p2 = por %p2072_p8, %p2071_p7 }
  0x1f   : > { %p2067_p4 = pneg %p2066_p1 }
  0x21   : > { %p2074_p3 = pnand %p2073_p2, %p2067_p4 }
  0x23   : > { %2077 = shalt.err (!%p2074_p3)
}
  0x24   : > { %1972 = dma.hbm_to_vmem [thread:$0]  (!%p2215_p5), %s2487_s14, 128, %s505_s1, [#allocation5]  }
  0x25   : > { %p2501_p9 = scmp.ne.s32.totalorder %s2499_s29, 0 }
  0x26   : > { %p2502_p10 = scmp.eq.s32.totalorder (!%p2501_p9), %s2202_s28, 0 }
  0x27   : > { %534 = sbr.rel (%p2501_p9) target bundleno = 2960 (0xb90), region = 92 }
  0x2c   : > { %2083 = dma.done.wait (%p2502_p10), [#allocation3], 128   ;;  %p2503_p6 = pmov %p2502_p10 }
  0x2e   : > { %2085 = vsyncadd (%p2503_p6), [#allocation3], 4294967168  ;;  %p2504_p11 = pmov %p2503_p6 }
  0x2f   : > { %p2505_p2 = pmov %p2503_p6 }
  0x30   : > { %2087 = dma.done.wait (%p2504_p11), [#allocation5], 128  }
  0x31   : > { %2089 = vsyncadd (%p2505_p2), [#allocation5], 4294967168  ;;  %p591_p3 = scmp.lt.s32.totalorder %s2202_s28, 1  ;;  %s2506_s0 = sld [smem:[#allocation8_spill]]  ;;  %vm606_vm0 = vcmask 130048   ;;  %vm756_vm1 = vcmask 785408  }
  0x32   : > { %s2507_s21 = sld [smem:[#allocation9_spill]]  ;;  %s2096_s23 = smov 127   ;;  %v707_v11 = vld [vmem:[%s2476_s3 + $0x8] sm:$0xff]  ;;  %v706_v12 = vld [vmem:[%s2476_s3] sm:$0xff]  ;;  %v2098_v13 = vmov 0   ;;  %vm741_vm2 = vcmask 252928  }
  0x33   : > { %s2512_s28 = smov (!%p591_p3, %s2202_s28), 1  ;;  %s2097_s24 = smov 1   ;;  %1992 = vset.pattern.permute.xlu0 %v2098_v13  ;;  %1993 = vset.pattern.permute.xlu1 %v2098_v13  ;;  %vm724_vm3 = vcmask 7168   ;;  %v850_v36 = vld [vmem:[%s2477_s4] sm:$0xff]  ;;  %vm882_vm5 = vcmask 392192   ;;  %v853_v40 = vld [vmem:[%s2478_s5 + $0x8] sm:$0xff] }
  0x34   : > { %s1764_s26 = sshll.u32 %s2512_s28, 5  ;;  %s2508_s29 = sld [smem:[#allocation10_spill]]  ;;  %vm2287_vm4 = vmneg %vm724_vm3  ;;  %v852_v39 = vld [vmem:[%s2478_s5] sm:$0xff]  ;;  %v851_v45 = vld [vmem:[%s2477_s4 + $0x8] sm:$0xff]  ;;  %vm980_vm6 = vcmask 261120   ;;  %vm2100_vm7 = vmmov 0  }
  0x35   : > { %v979_v46 = vld [vmem:[%s2479_s6 + $0x18] sm:$0xff]  ;;  %v978_v47 = vld [vmem:[%s2479_s6 + $0x10] sm:$0xff]  ;;  %v977_v48 = vld [vmem:[%s2479_s6 + $0x8] sm:$0xff]  ;;  %vm1080_vm8 = vcmask 515072   ;;  %vm1183_vm9 = vcmask 195584   ;;  %vm1271_vm10 = vcmask 523264  }
  0x36   : > { %v976_v49 = vld [vmem:[%s2479_s6] sm:$0xff]  ;;  %vm1355_vm11 = vcmask 1039360   ;;  %vm1543_vm12 = vcmask 64512   ;;  %s1704_s25 = sshll.u32 %s2512_s28, 2 }
  0x37   : > { %s595_s19 = scalar_lea.vmem %s2506_s0, %s1764_s26  ;;  %s599_s0 = scalar_lea.vmem %s2491_s18, %s1704_s25 }
  0x38   : > { %v605_v0 = vld [vmem:[%s2507_s21 + $0x8] sm:$0xff]  ;;  %v604_v1 = vld [vmem:[%s2507_s21] sm:$0xff]  ;;  %v602_v4 = vld [vmem:[%s595_s19 + $0x10] sm:$0xff] }
  0x39   : > { %v600_v2 = vld [vmem:[%s595_s19] sm:$0xff]  ;;  %1829 = vmatprep.subr.mxu0 %v605_v0  ;;  %v601_v3 = vld [vmem:[%s595_s19 + $0x8] sm:$0xff]  ;;  %v603_v5 = vld [vmem:[%s595_s19 + $0x18] sm:$0xff] }
  0x3a   : > { %1833 = vmatprep.mubr.msk.f32.mxu0 %vm606_vm0, %v600_v2  ;;  %1830 = vmatpush3.msra.mxu0 %v605_v0  ;;  %v704_v10 = vld [vmem:[%s2508_s29] sm:$0xff]  ;;  %v705_v23 = vld [vmem:[%s2508_s29 + $0x8] sm:$0xff]  ;;  %v2099_v0 = vmov 0.0  }
  0x3b   : > { %1831 = vmatprep.subr.mxu0 %v604_v1  ;;  %1863 = vmatprep.mubr.msk.f32.mxu1 %vm756_vm1, %v704_v10 }
  0x3c   : > { %1832 = vmatpush3.msra.mxu0 %v604_v1 }
  0x3d   : > { %1834 = vmatmul.mubr.msk.f32.vlgmr.msra.gmra.mxu0 %vm606_vm0, %v601_v3  ;;  %v1063_v3 = vld [vmem:[%s2481_s8] sm:$0xff] }
  0x3e   : > { %1836 = vmatprep.mubr.msk.f32.mxu0 %vm606_vm0, %v602_v4 }
  0x41   : > { %1837 = vmatmul.mubr.msk.f32.gmra.mxu0 %vm606_vm0, %v603_v5 }
  0x42   : > { %1878 = vmatprep.mubr.msk.f32.mxu0 %vm882_vm5, %v850_v36 }
  0xfd   : > { %v1835_v6 = vpop.f32.mrf.mxu0 }
  0xfe   : > { %731 = vrot.lane.b32.xlu1 %v1835_v6, %s2096_s23 }
  0xff   : > { %v685_v7 = vpop.f32.mrf.mxu0 }
 0x101   : > { %v1838_v8 = vpop.f32.mrf.mxu0 }
 0x102   : > { %729 = vrot.lane.b32.xlu1 %v685_v7, %s2096_s23  ;;  %735 = vrot.lane.b32.xlu0 %v1838_v8, %s2096_s23 }
 0x103   : > { %v695_v9 = vpop.f32.mrf.mxu0 }
 0x106   : > { %716 = vrot.lane.b32.xlu1 %v695_v9, %s2097_s24  ;;  %733 = vrot.lane.b32.xlu0 %v695_v9, %s2096_s23 }
 0x10a   : > { %712 = vrot.lane.b32.xlu1 %v685_v7, %s2097_s24  ;;  %718 = vrot.lane.b32.xlu0 %v1838_v8, %s2097_s24 }
 0x10e   : > { %714 = vrot.lane.b32.xlu0 %v1835_v6, %s2097_s24  ;;  %748 = vperm.xlu1 %1993, %v706_v12  }
 0x112   : > { %753 = vperm.xlu0 %1992, %v707_v11  }
 0x170   : > { %v732_v15 = vpop.permute.xlu1 %731 }
 0x174   : > { %v736_v14 = vpop.permute.xlu0 %735  ;;  %v730_v17 = vpop.permute.xlu1 %729 }
 0x175   : > { %1839 = vmatprep.subr.msk.mxu1 %vm741_vm2, %v736_v14 }
 0x176   : > { %1840 = vmatpush3.msk.msra.mxu1 %vm741_vm2, %v736_v14 }
 0x178   : > { %v734_v16 = vpop.permute.xlu0 %733  ;;  %v717_v20 = vpop.permute.xlu1 %716 }
 0x179   : > { %1841 = vmatprep.subr.msk.mxu1 %vm741_vm2, %v734_v16 }
 0x17a   : > { %1842 = vmatpush3.msk.msra.mxu1 %vm741_vm2, %v734_v16 }
 0x17b   : > { %1843 = vmatprep.subr.msk.mxu1 %vm741_vm2, %v732_v15 }
 0x17c   : > { %1844 = vmatpush3.msk.msra.mxu1 %vm741_vm2, %v732_v15  ;;  %v719_v18 = vpop.permute.xlu0 %718  ;;  %v713_v22 = vpop.permute.xlu1 %712 }
 0x17d   : > { %1845 = vmatprep.subr.msk.mxu1 %vm741_vm2, %v730_v17 }
 0x17e   : > { %1846 = vmatpush3.msk.msra.mxu1 %vm741_vm2, %v730_v17  ;;  %v1168_v17 = vld [vmem:[%s2483_s10] sm:$0xff] }
 0x17f   : > { %1847 = vmatprep.subr.mxu1 %v1838_v8 }
 0x180   : > { %1848 = vmatpush3.msra.mxu1 %v1838_v8  ;;  %v715_v21 = vpop.permute.xlu0 %714 }
 0x181   : > { %1849 = vmatprep.subr.mxu1 %v695_v9 }
 0x182   : > { %1850 = vmatpush3.msra.mxu1 %v695_v9 }
 0x183   : > { %1851 = vmatprep.subr.mxu1 %v1835_v6 }
 0x184   : > { %1852 = vmatpush3.msra.mxu1 %v1835_v6 }
 0x185   : > { %1853 = vmatprep.subr.mxu1 %v685_v7 }
 0x186   : > { %1854 = vmatpush3.msra.mxu1 %v685_v7  ;;  %v1062_v7 = vld [vmem:[#allocation2] sm:$0xff] }
 0x187   : > { %1855 = vmatprep.subr.msk.mxu1 %vm2287_vm4, %v719_v18 }
 0x188   : > { %1856 = vmatpush3.msk.msra.mxu1 %vm2287_vm4, %v719_v18 }
 0x189   : > { %1857 = vmatprep.subr.msk.mxu1 %vm2287_vm4, %v717_v20  ;;  %v749_v26 = vpop.permute.xlu1 %748 }
 0x18a   : > { %1858 = vmatpush3.msk.msra.mxu1 %vm2287_vm4, %v717_v20  ;;  %v1167_v20 = vld [vmem:[%s2482_s9] sm:$0xff] }
 0x18b   : > { %1859 = vmatprep.subr.msk.mxu1 %vm2287_vm4, %v715_v21 }
 0x18c   : > { %1860 = vmatpush3.msk.msra.mxu1 %vm2287_vm4, %v715_v21 }
 0x18d   : > { %1861 = vmatprep.subr.msk.mxu1 %vm2287_vm4, %v713_v22  ;;  %v754_v24 = vpop.permute.xlu0 %753 }
 0x18e   : > { %1862 = vmatpush3.msk.msra.mxu1 %vm2287_vm4, %v713_v22  ;;  %v1270_v22 = vld [vmem:[%s2484_s11 + $0x38] sm:$0xff] }
 0x18f   : > { %1864 = vmatmul.mubr.msk.f32.vlgmr.msra.gmra.mxu1 %vm756_vm1, %v705_v23  ;;  %1907 = vmatprep.subr.mxu1 %v2099_v0  ;;  %v1269_v23 = vld [vmem:[%s2484_s11 + $0x30] sm:$0xff] }
 0x190   : > { %1913 = vmatprep.mubr.msk.f32.mxu1 %vm2100_vm7, %v2099_v0 }
 0x24f   : > { %v1865_v25 = vpop.f32.mrf.mxu1 }
 0x250   : > { %v835_v27 = vadd.f32 %v1865_v25, %v754_v24  ;;  %v1268_v24 = vld [vmem:[%s2484_s11 + $0x28] sm:$0xff]  ;;  %v1267_v25 = vld [vmem:[%s2484_s11 + $0x20] sm:$0xff] }
 0x251   : > { %v829_v28 = vpop.f32.mrf.mxu1 }
 0x252   : > { %v1724_v29 = vmul.f32 -1.442695, %v835_v27  ;;  %v830_v30 = vadd.f32 %v829_v28, %v749_v26  ;;  %v1266_v26 = vld [vmem:[%s2484_s11 + $0x18] sm:$0xff]  ;;  %v1265_v27 = vld [vmem:[%s2484_s11 + $0x10] sm:$0xff]  ;;  %v1264_v28 = vld [vmem:[%s2484_s11 + $0x8] sm:$0xff] }
 0x254   : > { %1994 = vpow2.f32 %v1724_v29  ;;  %v1723_v31 = vmul.f32 -1.442695, %v830_v30  ;;  %v1263_v29 = vld [vmem:[%s2484_s11] sm:$0xff] }
 0x256   : > { %1996 = vpow2.f32 %v1723_v31 }
 0x261   : > { %v1995_v32 = vpop.eup %1994 }
 0x262   : > { %v845_v33 = vadd.f32 1.0, %v1995_v32 }
 0x263   : > { %v1997_v34 = vpop.eup %1996 }
 0x264   : > { %1998 = vrcp.f32 %v845_v33  ;;  %v844_v35 = vadd.f32 1.0, %v1997_v34 }
 0x266   : > { %2000 = vrcp.f32 %v844_v35 }
 0x271   : > { %v1999_v37 = vpop.eup %1998 }
 0x272   : > { %866 = vrot.lane.b32.xlu1 %v1999_v37, %s2096_s23 }
 0x273   : > { %v2001_v38 = vpop.eup %2000 }
 0x274   : > { %864 = vrot.lane.b32.xlu0 %v2001_v38, %s2096_s23 }
 0x276   : > { %858 = vrot.lane.b32.xlu1 %v1999_v37, %s2097_s24 }
 0x278   : > { %856 = vrot.lane.b32.xlu0 %v2001_v38, %s2097_s24 }
 0x27a   : > { %874 = vperm.xlu1 %1993, %v852_v39  }
 0x27c   : > { %879 = vperm.xlu0 %1992, %v853_v40   ;;  %v1346_v40 = vld [vmem:[%s2486_s13] sm:$0xff] }
 0x2e4   : > { %v867_v41 = vpop.permute.xlu1 %866 }
 0x2e5   : > { %1866 = vmatprep.subr.msk.mxu0 %vm741_vm2, %v867_v41 }
 0x2e6   : > { %1867 = vmatpush3.msk.msra.mxu0 %vm741_vm2, %v867_v41  ;;  %v865_v42 = vpop.permute.xlu0 %864 }
 0x2e7   : > { %1868 = vmatprep.subr.msk.mxu0 %vm741_vm2, %v865_v42 }
 0x2e8   : > { %1869 = vmatpush3.msk.msra.mxu0 %vm741_vm2, %v865_v42  ;;  %v859_v43 = vpop.permute.xlu1 %858  ;;  %v1345_v42 = vld [vmem:[%s2485_s12] sm:$0xff] }
 0x2e9   : > { %1870 = vmatprep.subr.mxu0 %v1999_v37 }
 0x2ea   : > { %1871 = vmatpush3.msra.mxu0 %v1999_v37  ;;  %v857_v44 = vpop.permute.xlu0 %856 }
 0x2eb   : > { %1872 = vmatprep.subr.mxu0 %v2001_v38 }
 0x2ec   : > { %1873 = vmatpush3.msra.mxu0 %v2001_v38 }
 0x2ed   : > { %1874 = vmatprep.subr.msk.mxu0 %vm2287_vm4, %v859_v43 }
 0x2ee   : > { %1875 = vmatpush3.msk.msra.mxu0 %vm2287_vm4, %v859_v43 }
 0x2ef   : > { %1876 = vmatprep.subr.msk.mxu0 %vm2287_vm4, %v857_v44 }
 0x2f0   : > { %1877 = vmatpush3.msk.msra.mxu0 %vm2287_vm4, %v857_v44 }
 0x2f1   : > { %1879 = vmatmul.mubr.msk.f32.vlgmr.msra.gmra.mxu0 %vm882_vm5, %v851_v45  ;;  %1881 = vmatprep.subr.mxu0 %v979_v46 }
 0x2f2   : > { %1882 = vmatpush3.msra.mxu0 %v979_v46 }
 0x2f3   : > { %1883 = vmatprep.subr.mxu0 %v978_v47 }
 0x2f4   : > { %1884 = vmatpush3.msra.mxu0 %v978_v47 }
 0x2f5   : > { %1885 = vmatprep.subr.mxu0 %v977_v48  ;;  %v875_v53 = vpop.permute.xlu1 %874 }
 0x2f6   : > { %1886 = vmatpush3.msra.mxu0 %v977_v48 }
 0x2f7   : > { %1887 = vmatprep.subr.mxu0 %v976_v49  ;;  %v880_v50 = vpop.permute.xlu0 %879 }
 0x2f8   : > { %1888 = vmatpush3.msra.mxu0 %v976_v49 }
 0x2f9   : > { %1892 = vmatprep.subr.mxu0 %v2099_v0 }
 0x3b1   : > { %v1880_v51 = vpop.f32.mrf.mxu0 }
 0x3b2   : > { %v961_v52 = vadd.f32 %v1880_v51, %v880_v50 }
 0x3b3   : > { %v955_v54 = vpop.f32.mrf.mxu0 }
 0x3b4   : > { %v1734_v55 = vmul.f32 -1.442695, %v961_v52  ;;  %v956_v56 = vadd.f32 %v955_v54, %v875_v53  ;;  %v1537_v52 = vld [vmem:[%s2490_s17] sm:$0x7] }
 0x3b5   : > { %v1442_v53 = vld [vmem:[%s2488_s15] sm:$0xff] }
 0x3b6   : > { %2002 = vpow2.f32 %v1734_v55  ;;  %v1733_v57 = vmul.f32 -1.442695, %v956_v56  ;;  %v1441_v55 = vld [vmem:[#allocation4] sm:$0xff] }
 0x3b8   : > { %2004 = vpow2.f32 %v1733_v57 }
 0x3c3   : > { %v2003_v58 = vpop.eup %2002 }
 0x3c4   : > { %v971_v60 = vadd.f32 1.0, %v2003_v58 }
 0x3c5   : > { %v2005_v59 = vpop.eup %2004 }
 0x3c6   : > { %v970_v61 = vadd.f32 1.0, %v2005_v59 }
 0x3c8   : > { %2006 = vrcp.f32 %v970_v61 }
 0x3c9   : > { %2008 = vrcp.f32 %v971_v60 }
 0x3d5   : > { %v2007_v62 = vpop.eup %2006 }
 0x3d6   : > { %v2009_v63 = vpop.eup %2008  ;;  %1889 = vmatprep.mubr.msk.f32.mxu0 %vm980_vm6, %v2007_v62 }
 0x3d7   : > { %1890 = vmatmul.mubr.msk.f32.vlgmr.msra.gmra.mxu0 %vm980_vm6, %v2009_v63 }
 0x3d8   : > { %1904 = vmatprep.mubr.msk.f32.mxu0 %vm2100_vm7, %v2099_v0 }
 0x497   : > { %v1891_v1 = vpop.f32.mrf.mxu0 }
 0x498   : > { %1076 = vrot.lane.b32.xlu1 %v1891_v1, %s2096_s23 }
 0x499   : > { %v1053_v2 = vpop.f32.mrf.mxu0 }
 0x49a   : > { %1074 = vrot.lane.b32.xlu0 %v1053_v2, %s2096_s23 }
 0x49c   : > { %1068 = vrot.lane.b32.xlu1 %v1891_v1, %s2097_s24 }
 0x49e   : > { %1066 = vrot.lane.b32.xlu0 %v1053_v2, %s2097_s24 }
 0x4a0   : > { %1085 = vperm.xlu1 %1993, %v1063_v3  }
 0x50a   : > { %v1077_v4 = vpop.permute.xlu1 %1076 }
 0x50b   : > { %1893 = vmatpush3.msk.msra.mxu0 %vm1080_vm8, %v1077_v4 }
 0x50c   : > { %1894 = vmatprep.subr.mxu0 %v2099_v0  ;;  %v1075_v5 = vpop.permute.xlu0 %1074 }
 0x50d   : > { %1895 = vmatpush3.msk.msra.mxu0 %vm1080_vm8, %v1075_v5 }
 0x50e   : > { %1896 = vmatprep.subr.mxu0 %v2099_v0  ;;  %v1069_v6 = vpop.permute.xlu1 %1068 }
 0x50f   : > { %1897 = vmatpush3.msra.mxu0 %v1891_v1  ;;  %v1536_v1 = vld [vmem:[%s2489_s16] sm:$0x7] }
 0x510   : > { %1898 = vmatprep.subr.mxu0 %v2099_v0  ;;  %v1067_v8 = vpop.permute.xlu0 %1066 }
 0x511   : > { %1899 = vmatpush3.msra.mxu0 %v1053_v2 }
 0x512   : > { %1900 = vmatprep.subr.mxu0 %v2099_v0 }
 0x513   : > { %1901 = vmatpush3.msk.msra.mxu0 %vm2287_vm4, %v1069_v6 }
 0x514   : > { %1902 = vmatprep.subr.mxu0 %v2099_v0 }
 0x515   : > { %1903 = vmatpush3.msk.msra.mxu0 %vm2287_vm4, %v1067_v8 }
 0x516   : > { %1905 = vmatmul.mubr.msk.f32.vlgmr.msra.gmra.mxu0 %vm882_vm5, %v1062_v7  ;;  %1935 = vmatprep.subr.mxu0 %v2099_v0 }
 0x517   : > { %1941 = vmatprep.mubr.msk.f32.mxu0 %vm2100_vm7, %v2099_v0 }
 0x51b   : > { %v1086_v9 = vpop.permute.xlu1 %1085 }
 0x5d6   : > { %v1157_v10 = vpop.f32.mrf.mxu0 }
 0x5d7   : > { %v1158_v11 = vadd.f32 %v1157_v10, %v1086_v9 }
 0x5d8   : > { %v1906_v12 = vpop.f32.mrf.mxu0 }
 0x5d9   : > { %v1744_v13 = vmul.f32 -1.442695, %v1158_v11 }
 0x5db   : > { %2010 = vpow2.f32 %v1744_v13 }
 0x5e8   : > { %v2011_v14 = vpop.eup %2010 }
 0x5e9   : > { %v1164_v15 = vadd.f32 1.0, %v2011_v14 }
 0x5eb   : > { %2012 = vrcp.f32 %v1164_v15 }
 0x5f8   : > { %v2013_v16 = vpop.eup %2012 }
 0x5f9   : > { %1170 = vrot.lane.b32.xlu1 %v2013_v16, %s2097_s24  ;;  %1174 = vrot.lane.b32.xlu0 %v2013_v16, %s2096_s23 }
 0x5fd   : > { %1180 = vperm.xlu0 %1992, %v1168_v17  }
 0x66b   : > { %v1175_v18 = vpop.permute.xlu0 %1174  ;;  %v1171_v21 = vpop.permute.xlu1 %1170 }
 0x66c   : > { %1908 = vmatpush3.msk.msra.mxu1 %vm1080_vm8, %v1175_v18 }
 0x66d   : > { %1909 = vmatprep.subr.mxu1 %v2099_v0 }
 0x66e   : > { %1910 = vmatpush3.msra.mxu1 %v2013_v16 }
 0x66f   : > { %1911 = vmatprep.subr.mxu1 %v2099_v0 }
 0x670   : > { %1912 = vmatpush3.msk.msra.mxu1 %vm2287_vm4, %v1171_v21 }
 0x671   : > { %1914 = vmatmul.mubr.msk.f32.vlgmr.msra.gmra.mxu1 %vm1183_vm9, %v1167_v20  ;;  %1916 = vmatprep.subr.mxu1 %v2099_v0 }
 0x672   : > { %1932 = vmatprep.mubr.msk.f32.mxu1 %vm2100_vm7, %v2099_v0  ;;  %1917 = vmatpush3.msra.mxu1 %v1270_v22 }
 0x673   : > { %1918 = vmatprep.subr.mxu1 %v2099_v0 }
 0x674   : > { %1919 = vmatpush3.msra.mxu1 %v1269_v23 }
 0x675   : > { %1920 = vmatprep.subr.mxu1 %v2099_v0 }
 0x676   : > { %1921 = vmatpush3.msra.mxu1 %v1268_v24 }
 0x677   : > { %1922 = vmatprep.subr.mxu1 %v2099_v0 }
 0x678   : > { %1923 = vmatpush3.msra.mxu1 %v1267_v25  ;;  %v1181_v30 = vpop.permute.xlu0 %1180 }
 0x679   : > { %1924 = vmatprep.subr.mxu1 %v2099_v0 }
 0x67a   : > { %1925 = vmatpush3.msra.mxu1 %v1266_v26 }
 0x67b   : > { %1926 = vmatprep.subr.mxu1 %v2099_v0 }
 0x67c   : > { %1927 = vmatpush3.msra.mxu1 %v1265_v27 }
 0x67d   : > { %1928 = vmatprep.subr.mxu1 %v2099_v0 }
 0x67e   : > { %1929 = vmatpush3.msra.mxu1 %v1264_v28 }
 0x67f   : > { %1930 = vmatprep.subr.mxu1 %v2099_v0 }
 0x680   : > { %1931 = vmatpush3.msra.mxu1 %v1263_v29 }
 0x681   : > { %1953 = vmatprep.subr.mxu1 %v2099_v0 }
 0x731   : > { %v1253_v31 = vpop.f32.mrf.mxu1 }
 0x732   : > { %v1254_v32 = vadd.f32 %v1253_v31, %v1181_v30 }
 0x733   : > { %v1915_v33 = vpop.f32.mrf.mxu1 }
 0x734   : > { %v1749_v34 = vmul.f32 -1.442695, %v1254_v32 }
 0x736   : > { %2014 = vpow2.f32 %v1749_v34 }
 0x743   : > { %v2015_v35 = vpop.eup %2014 }
 0x744   : > { %v1260_v36 = vadd.f32 1.0, %v2015_v35 }
 0x746   : > { %2016 = vrcp.f32 %v1260_v36 }
 0x753   : > { %v2017_v37 = vpop.eup %2016 }
 0x754   : > { %1933 = vmatmul.mubr.msk.f32.vlgmr.msra.gmra.mxu1 %vm1271_vm10, %v2017_v37 }
 0x755   : > { %1955 = vmatprep.mubr.msk.f32.mxu1 %vm2100_vm7, %v2099_v0 }
 0x814   : > { %v1341_v38 = vpop.f32.mrf.mxu1 }
 0x815   : > { %1348 = vrot.lane.b32.xlu0 %v1341_v38, %s2097_s24  ;;  %1352 = vrot.lane.b32.xlu1 %v1341_v38, %s2096_s23 }
 0x816   : > { %v1934_v39 = vpop.f32.mrf.mxu1 }
 0x819   : > { %1359 = vperm.xlu1 %1993, %v1346_v40  }
 0x887   : > { %v1353_v41 = vpop.permute.xlu1 %1352  ;;  %v1349_v43 = vpop.permute.xlu0 %1348 }
 0x888   : > { %1936 = vmatpush3.msk.msra.mxu0 %vm1355_vm11, %v1353_v41 }
 0x889   : > { %1937 = vmatprep.subr.mxu0 %v2099_v0 }
 0x88a   : > { %1938 = vmatpush3.msra.mxu0 %v1341_v38 }
 0x88b   : > { %1939 = vmatprep.subr.mxu0 %v2099_v0 }
 0x88c   : > { %1940 = vmatpush3.msk.msra.mxu0 %vm2287_vm4, %v1349_v43 }
 0x88d   : > { %1942 = vmatmul.mubr.msk.f32.vlgmr.msra.gmra.mxu0 %vm1183_vm9, %v1345_v42  ;;  %1944 = vmatprep.subr.mxu0 %v2099_v0 }
 0x88e   : > { %1950 = vmatprep.mubr.msk.f32.mxu0 %vm2100_vm7, %v2099_v0 }
 0x894   : > { %v1360_v44 = vpop.permute.xlu1 %1359 }
 0x94d   : > { %v1431_v45 = vpop.f32.mrf.mxu0 }
 0x94e   : > { %v1432_v46 = vadd.f32 %v1431_v45, %v1360_v44 }
 0x94f   : > { %v1943_v47 = vpop.f32.mrf.mxu0 }
 0x950   : > { %v1755_v48 = vmul.f32 -1.442695, %v1432_v46 }
 0x952   : > { %2018 = vpow2.f32 %v1755_v48 }
 0x95f   : > { %v2019_v49 = vpop.eup %2018 }
 0x960   : > { %v1438_v50 = vadd.f32 1.0, %v2019_v49 }
 0x962   : > { %2020 = vrcp.f32 %v1438_v50 }
 0x96f   : > { %v2021_v51 = vpop.eup %2020 }
 0x970   : > { %1444 = vrot.lane.b32.xlu1 %v2021_v51, %s2097_s24  ;;  %1448 = vrot.lane.b32.xlu0 %v2021_v51, %s2096_s23 }
 0x974   : > { %1540 = vperm.xlu1 %1993, %v1537_v52   ;;  %1454 = vperm.xlu0 %1992, %v1442_v53  }
 0x9e2   : > { %v1449_v54 = vpop.permute.xlu0 %1448  ;;  %v1445_v56 = vpop.permute.xlu1 %1444 }
 0x9e3   : > { %1945 = vmatpush3.msk.msra.mxu0 %vm1355_vm11, %v1449_v54 }
 0x9e4   : > { %1946 = vmatprep.subr.mxu0 %v2099_v0 }
 0x9e5   : > { %1947 = vmatpush3.msra.mxu0 %v2021_v51 }
 0x9e6   : > { %1948 = vmatprep.subr.mxu0 %v2099_v0 }
 0x9e7   : > { %1949 = vmatpush3.msk.msra.mxu0 %vm2287_vm4, %v1445_v56 }
 0x9e8   : > { %1951 = vmatmul.mubr.msk.f32.vlgmr.msra.gmra.mxu0 %vm1183_vm9, %v1441_v55 }
 0x9ef   : > { %v1455_v57 = vpop.permute.xlu0 %1454  ;;  %v1541_v19 = vpop.permute.xlu1 %1540 }
 0xaa8   : > { %v1526_v58 = vpop.f32.mrf.mxu0 }
 0xaa9   : > { %v1527_v59 = vadd.f32 %v1526_v58, %v1455_v57 }
 0xaaa   : > { %v1952_v60 = vpop.f32.mrf.mxu0 }
 0xaab   : > { %v1760_v61 = vmul.f32 -1.442695, %v1527_v59 }
 0xaad   : > { %2022 = vpow2.f32 %v1760_v61 }
 0xaba   : > { %v2023_v62 = vpop.eup %2022 }
 0xabb   : > { %v1533_v63 = vadd.f32 1.0, %v2023_v62 }
 0xabd   : > { %2024 = vrcp.f32 %v1533_v63 }
 0xaca   : > { %v2025_v0 = vpop.eup %2024 }
 0xacb   : > { %1954 = vmatpush3.msra.mxu1 %v2025_v0 }
 0xacc   : > { %1956 = vmatmul.mubr.msk.f32.vlgmr.msra.gmra.mxu1 %vm1543_vm12, %v1536_v1 }
 0xb8c   : > { %v1613_v2 = vpop.f32.mrf.mxu1 }
 0xb8d   : > { %v1614_v3 = vadd.f32 %v1613_v2, %v1541_v19 }
 0xb8e   : > { %v1957_v4 = vpop.f32.mrf.mxu1 }
 0xb8f   : > { %1617 = vst [vmem:[%s599_s0] sm:$0x7] %v1614_v3 }
 0xb90 PF: > { %s30_s27 = sadd.s32 1, %s2092_s27  }
 0xb91   : > { %p27_p5 = scmp.ge.s32.totalorder %s30_s27, 4  }
 0xb93   :  { %29 = sbr.rel (!%p27_p5) target bundleno = 6 (0x6), region = 131 }
 0xb98   :  { %1637 = vsyncpa [#allocation3], 1 }
 0xb99   :  { %1639 = vsyncpa [#allocation3 + $0x1], 1 }
 0xb9a   :  { %1640 = vsyncpa [#allocation5], 1 }

</bundles_post_ra>
